<compile_context>
chip_gen: v7x
topology: tpu7x:2x2x1
jax: 0.10.0
libtpu: 0.0.40
codegen_flags: <defaults>
</compile_context>

<pallas_src>
import functools

import jax
import jax.numpy as jnp
from jax.experimental import pallas as pl
from jax.experimental.pallas import tpu as pltpu


def _round_up(x, m):
    return (x + m - 1) // m * m


# --------------------------- kernel 1: hoisted feature projection ---------------------------

def _project_kernel(x_ref, w_ref, h_ref):
    # One MXU matmul per node tile: h_aug = x @ [W | W@att_src^T | W@att_dst^T | 0-pad].
    h = jnp.dot(x_ref[...], w_ref[...], preferred_element_type=jnp.float32)
    h_ref[...] = h.astype(h_ref.dtype)


def _project(x_pad, w_aug, *, tile):
    n_pad, f_in_pad = x_pad.shape
    f_pad = w_aug.shape[1]
    return pl.pallas_call(
        _project_kernel,
        out_shape=jax.ShapeDtypeStruct((n_pad, f_pad), jnp.bfloat16),
        grid=(n_pad // tile,),
        in_specs=[
            pl.BlockSpec((tile, f_in_pad), lambda i: (i, 0)),     # node-tile of features
            pl.BlockSpec((f_in_pad, f_pad), lambda i: (0, 0)),    # augmented weights (resident)
        ],
        out_specs=pl.BlockSpec((tile, f_pad), lambda i: (i, 0)),
        compiler_params=pltpu.CompilerParams(dimension_semantics=("parallel",)),
    )(x_pad, w_aug)


# --------------------------- kernel 2: masked softmax + aggregation ---------------------------

def _gat_attn_kernel(h_ref, a_src_ref, a_dst_ref, b_ref, adj_ref, out_ref, *,
                     f_out, activation):
    a_src = a_src_ref[...]                          # [1, N_pad] f32, lane-dense (precomputed)
    a_dst = a_dst_ref[...]                          # [T, 1]     f32
    adj = adj_ref[...].astype(jnp.float32)          # [T, N_pad] 0/1 mask (streamed as int8)

    # Edge logits e[i, j] = LeakyReLU(a_dst[i] + a_src[j], 0.2); masked entries -> -1e9.
    e = a_dst + a_src
    e = jnp.where(e > 0, e, 0.2 * e)
    e = jnp.where(adj > 0, e, jnp.float32(-1e9))

    # Masked softmax over incoming edges (single mask: exp of -1e9-shifted logits underflows to 0).
    m = jnp.max(e, axis=-1, keepdims=True)
    p = jnp.exp(e - m)
    denom = jnp.maximum(jnp.sum(p, axis=-1, keepdims=True), 1e-20)   # guard padded/isolated rows
    alpha = p * pl.reciprocal(denom, approx=True)

    # Aggregate: out[i] = sum_j alpha[i, j] * h_aug[j] + bias   (bf16 operands, f32 accumulation)
    out = jnp.dot(alpha.astype(jnp.bfloat16), h_ref[...],
                  preferred_element_type=jnp.float32)
    out = out + b_ref[...]

    if activation == "relu":
        out = jnp.maximum(out, 0.0)
    elif activation == "log_softmax":
        # log_softmax restricted to the first f_out (real) class lanes.
        col = jax.lax.broadcasted_iota(jnp.int32, out.shape, 1)
        valid = col < f_out
        zm = jnp.where(valid, out, jnp.float32(-1e30))
        mm = jnp.max(zm, axis=-1, keepdims=True)
        lse = jnp.log(jnp.sum(jnp.exp(zm - mm), axis=-1, keepdims=True))
        out = out - mm - lse

    out_ref[...] = out.astype(out_ref.dtype)


def gat_layer(x_pad, adj_pad, w, att_src, att_dst, bias, *, activation,
              out_dtype=jnp.float32, tile_dst=256):
    """One dense GATConv layer (heads=1) tiled over destination nodes.

    x_pad:   [N_pad, F_in_pad] bf16 (zero-padded)
    adj_pad: [N_pad, N_pad]    int8 0/1 mask, adj[dst, src] = 1 (self-loops included)
    Returns a padded [N_pad, F_pad] output (real features in the first w.shape[1] lanes).
    """
    n_pad, f_in_pad = x_pad.shape
    f_in, f_out = w.shape
    f_pad = _round_up(f_out + 2, 128)
    assert n_pad % tile_dst == 0 and f_in <= f_in_pad

    # Fold the attention projections into the weight matrix:
    #   cols [0:f_out) = W,  col f_out = W @ att_src^T,  col f_out+1 = W @ att_dst^T.
    w_aug = jnp.zeros((f_in_pad, f_pad), jnp.float32)
    w_aug = w_aug.at[:f_in, :f_out].set(w)
    w_aug = w_aug.at[:f_in, f_out].set((w @ att_src.T)[:, 0])
    w_aug = w_aug.at[:f_in, f_out + 1].set((w @ att_dst.T)[:, 0])
    w_aug = w_aug.astype(jnp.bfloat16)

    # Hoisted full-graph projection: ONE MXU pass per layer, not one per destination tile.
    h_aug = _project(x_pad, w_aug, tile=tile_dst)                    # [N_pad, F_pad] bf16

    # Per-node attention scalars, relayouted once in the wrapper (lane-dense a_src row).
    a_src = h_aug[:, f_out].astype(jnp.float32).reshape(1, n_pad)
    a_dst = h_aug[:, f_out + 1].astype(jnp.float32).reshape(n_pad, 1)

    b_pad = jnp.zeros((1, f_pad), jnp.float32).at[:, :f_out].set(bias)

    n_tiles = n_pad // tile_dst
    # Deeper pipelining on the only O(N^2) streamed operand once there is DMA latency to hide.
    if n_tiles >= 3:
        adj_spec = pl.BlockSpec((tile_dst, n_pad), lambda i: (i, 0),
                                pipeline_mode=pl.Buffered(3))
    else:
        adj_spec = pl.BlockSpec((tile_dst, n_pad), lambda i: (i, 0))

    kernel = functools.partial(_gat_attn_kernel, f_out=f_out, activation=activation)

    # NOTE: constant-index_map operands (h_aug, a_src, bias) have unchanging blocks; Pallas does
    # not re-copy them per step. TODO(synk): verify they are not double-buffer allocated on v7x.
    return pl.pallas_call(
        kernel,
        out_shape=jax.ShapeDtypeStruct((n_pad, f_pad), out_dtype),
        grid=(n_tiles,),
        in_specs=[
            pl.BlockSpec((n_pad, f_pad), lambda i: (0, 0)),        # h_aug, resident bf16
            pl.BlockSpec((1, n_pad), lambda i: (0, 0)),            # a_src row, resident
            pl.BlockSpec((tile_dst, 1), lambda i: (i, 0)),         # a_dst column, tiled
            pl.BlockSpec((1, f_pad), lambda i: (0, 0)),            # bias, resident
            adj_spec,                                              # adjacency slab (int8, streamed)
        ],
        out_specs=pl.BlockSpec((tile_dst, f_pad), lambda i: (i, 0)),
        compiler_params=pltpu.CompilerParams(
            dimension_semantics=("parallel",)),                    # shard dst tiles across TCs
    )(h_aug, a_src, a_dst, b_pad, adj_pad)


def gat_forward(x, adj, params, *, tile_dst=256):
    """Inference forward of the 2-layer GAT (dropout is identity at eval time)."""
    n, f_in = x.shape
    dim_out = params["w2"].shape[1]
    n_pad = _round_up(n, tile_dst)
    f_in_pad = _round_up(f_in, 128)

    x_pad = jnp.zeros((n_pad, f_in_pad), jnp.bfloat16)
    x_pad = x_pad.at[:n, :f_in].set(x.astype(jnp.bfloat16))
    adj_pad = jnp.zeros((n_pad, n_pad), jnp.int8)
    adj_pad = adj_pad.at[:n, :n].set(adj.astype(jnp.int8))

    h1 = gat_layer(x_pad, adj_pad, params["w1"], params["asrc1"], params["adst1"],
                   params["b1"], activation="relu", out_dtype=jnp.bfloat16,
                   tile_dst=tile_dst)
    out = gat_layer(h1, adj_pad, params["w2"], params["asrc2"], params["adst2"],
                    params["b2"], activation="log_softmax", out_dtype=jnp.float32,
                    tile_dst=tile_dst)
    return out[:n, :dim_out]


# ----------------------------- pure-JAX reference -----------------------------

def _gat_layer_ref(x, adj, w, att_src, att_dst, bias):
    h = x @ w
    a_src = h @ att_src.T                      # [N, 1]
    a_dst = h @ att_dst.T                      # [N, 1]
    e = a_dst + a_src.T                        # e[i, j] = a_dst[i] + a_src[j]
    e = jnp.where(e > 0, e, 0.2 * e)
    e = jnp.where(adj > 0, e, -jnp.inf)
    alpha = jax.nn.softmax(e, axis=-1)
    return alpha @ h + bias


def gat_forward_ref(x, adj, params):
    h1 = jax.nn.relu(_gat_layer_ref(x, adj, params["w1"], params["asrc1"],
                                    params["adst1"], params["b1"]))
    o = _gat_layer_ref(h1, adj, params["w2"], params["asrc2"],
                       params["adst2"], params["b2"])
    return jax.nn.log_softmax(o, axis=-1)


def init_params(key, dim_in, dim_h, dim_out):
    """Deterministic glorot-style init matching GATConv parameter shapes."""
    ks = jax.random.split(key, 6)

    def glorot(k, shape):
        fan_in, fan_out = shape[0], shape[-1]
        scale = jnp.sqrt(6.0 / (fan_in + fan_out))
        return jax.random.uniform(k, shape, jnp.float32, -scale, scale)

    return dict(
        w1=glorot(ks[0], (dim_in, dim_h)),
        asrc1=glorot(ks[1], (1, dim_h)),
        adst1=glorot(ks[2], (1, dim_h)),
        b1=jnp.zeros((1, dim_h), jnp.float32),
        w2=glorot(ks[3], (dim_h, dim_out)),
        asrc2=glorot(ks[4], (1, dim_out)),
        adst2=glorot(ks[5], (1, dim_out)),
        b2=jnp.zeros((1, dim_out), jnp.float32),
    )


if __name__ == "__main__":
    key = jax.random.PRNGKey(0)
    k_x, k_adj, k_p = jax.random.split(key, 3)

    N = 64        # nodes in the (synthetic) mini-batch subgraph
    DIM_IN = 32   # input feature dim
    DIM_H = 32    # hidden dim
    DIM_OUT = 8   # number of classes

    x = jax.random.normal(k_x, (N, DIM_IN), jnp.float32)

    # Synthetic sparse directed graph as a dense adjacency mask (adj[dst, src] = 1),
    # plus self-loops, replicating GATConv's add_self_loops=True.
    adj = (jax.random.uniform(k_adj, (N, N)) < 0.1).astype(jnp.float32)
    adj = jnp.maximum(adj, jnp.eye(N, dtype=jnp.float32))

    params = init_params(k_p, DIM_IN, DIM_H, DIM_OUT)

    out = gat_forward(x, adj, params)
    out = jax.block_until_ready(out)

    assert out.shape == (N, DIM_OUT)
    assert bool(jnp.all(jnp.isfinite(out)))
    # log_softmax rows must exponentiate-and-sum to ~1
    assert jnp.allclose(jnp.sum(jnp.exp(out), axis=1), 1.0, atol=1e-4)
    # compare against the f32 pure-JAX reference (bf16 matmuls + approx recip => loose tol)
    ref = gat_forward_ref(x, adj, params)
    assert jnp.allclose(out, ref, atol=2e-1)

    print("KERNEL_OK")
</pallas_src>

<mosaic_0001>
module attributes {stable_mosaic.version = 11 : i64} {
  func.func @_project_kernel(%arg0: i32, %arg1: memref<256x128xbf16, #tpu.memory_space<vmem>>, %arg2: memref<128x128xbf16, #tpu.memory_space<vmem>>, %arg3: memref<256x128xbf16, #tpu.memory_space<vmem>>) attributes {dimension_semantics = [#tpu.dimension_semantics<parallel>], iteration_bounds = array<i64: 1>, scalar_prefetch = 0 : i64, scratch_operands = 0 : i64, tpu.core_type = #tpu.core_type<tc>, window_params = [{transform_indices = @transform_0, window_bounds = array<i64: 256, 128>}, {pipeline_mode = #tpu.pipeline_mode<synchronous>, transform_indices = @transform_1, window_bounds = array<i64: 128, 128>}, {transform_indices = @transform_2, window_bounds = array<i64: 256, 128>}]} {
    %c0 = arith.constant 0 : index
    %c0_0 = arith.constant 0 : index
    %0 = vector.load %arg1[%c0, %c0_0] : memref<256x128xbf16, #tpu.memory_space<vmem>>, vector<256x128xbf16>
    %c0_1 = arith.constant 0 : index
    %c0_2 = arith.constant 0 : index
    %1 = vector.load %arg2[%c0_1, %c0_2] : memref<128x128xbf16, #tpu.memory_space<vmem>>, vector<128x128xbf16>
    %cst = arith.constant dense<0.000000e+00> : vector<256x128xf32>
    %2 = tpu.matmul %0, %1, %cst {dimension_numbers = #tpu.dot_dimension_numbers<[1], [0], [0], [1], [0, 0, 1, 1], [], []>} : vector<256x128xbf16>, vector<128x128xbf16>, vector<256x128xf32> -> vector<256x128xf32>
    %3 = arith.truncf %2 : vector<256x128xf32> to vector<256x128xbf16>
    %c0_3 = arith.constant 0 : index
    %c0_4 = arith.constant 0 : index
    %4 = vector.load %arg3[%c0_3, %c0_4] : memref<256x128xbf16, #tpu.memory_space<vmem>>, vector<256x128xbf16>
    tpu.vector_store %arg3[%c0_3, %c0_4], %3 {strides = array<i32>} : memref<256x128xbf16, #tpu.memory_space<vmem>>, vector<256x128xbf16>,
    return
  }
  func.func @transform_0(%arg0: i32) -> (i32, i32) {
    %c0_i32 = arith.constant 0 : i32
    %c0_i32_0 = arith.constant 0 : i32
    return %arg0, %c0_i32 : i32, i32
  }
  func.func @transform_1(%arg0: i32) -> (i32, i32) {
    %c0_i32 = arith.constant 0 : i32
    %c0_i32_0 = arith.constant 0 : i32
    %c0_i32_1 = arith.constant 0 : i32
    return %c0_i32, %c0_i32_0 : i32, i32
  }
  func.func @transform_2(%arg0: i32) -> (i32, i32) {
    %c0_i32 = arith.constant 0 : i32
    %c0_i32_0 = arith.constant 0 : i32
    return %arg0, %c0_i32 : i32, i32
  }
}

</mosaic_0001>

<bundles_post_ra>
// kernel: tpu_custom_call.1
= control target key start
LH: loop header
LB: loop body
LE: loop exit
PB: predicated region body
PF: predicated region fallthrough
CT: control target
= control target key end

     0   :  { %7 = vsyncpa [#allocation3], 0  ;;  %s1009_s0 = inlined_call_operand.hbm [shape: bf16[256,128], index: 0, kind: input, shape index: {}]   ;;  %s1010_s1 = inlined_call_operand.hbm [shape: bf16[128,128], index: 1, kind: input, shape index: {}]   ;;  %s1011_s2 = inlined_call_operand.hbm [shape: bf16[256,128], index: 2, kind: output, shape index: {}]  }
   0x1   :  { %8 = vsyncpa [#allocation6], 0 }
   0x2   :  { %9 = vsyncpa [#allocation4], 0  ;;  %s944_s9 = smov [#allocation2]   ;;  %s872_s13 = scalar_lea.hbm %s1009_s0, 2048 }
   0x3   :  { %s15_s10 = sshll.u32 %s944_s9, 4  ;;  %p873_p0 = scmp.ne.s32.totalorder %s1009_s0, %s872_s13  ;;  %s16_s10 = int_to_ptr.vmem [resolvable:$true] %s15_s10 }
   0x4   :  { %p876_p1 = scmp.lt.u32.totalorder %s872_s13, %s1009_s0 }
   0x6   :  { %p878_p2 = pnand %p876_p1, %p873_p0 }
   0x8   :  { %881 = shalt.err (!%p878_p2)
}
   0x9   :  { %s882_s18 = scalar_lea.vmem %s16_s10, 2048  ;;  %p887_p4 = scmp.lt.s32.totalorder %s16_s10, %s16_s10 }
   0xa   :  { %p883_p3 = scmp.ne.s32.totalorder %s16_s10, %s882_s18  ;;  %p888_p5 = scmp.lt.s32.totalorder %s882_s18, %s882_s18 }
   0xc   :  { %p889_p6 = por %p888_p5, %p887_p4 }
   0xe   :  { %p890_p7 = pnand %p889_p6, %p883_p3 }
  0x10   :  { %893 = shalt.err (!%p890_p7)
}
  0x11   :  { %s945_s19 = smov 64   ;;  %s946_s20 = smov 4  }
  0x12   :  { %21 = dma.hbm_to_vmem [thread:$0]  %s1009_s0, 2048, %s16_s10, [#allocation3], %s945_s19, %s945_s19, %s946_s20  }
  0x13   :  { %s947_s23 = smov [#allocation5]   ;;  %s894_s27 = scalar_lea.hbm %s1010_s1, 1024 }
  0x14   :  { %s27_s24 = sshll.u32 %s947_s23, 4  ;;  %p895_p8 = scmp.ne.s32.totalorder %s1010_s1, %s894_s27  ;;  %s28_s24 = int_to_ptr.vmem [resolvable:$true] %s27_s24 }
  0x15   :  { %p898_p9 = scmp.lt.u32.totalorder %s894_s27, %s1010_s1 }
  0x17   :  { %p900_p10 = pnand %p898_p9, %p895_p8 }
  0x19   :  { %903 = shalt.err (!%p900_p10)
}
  0x1a   :  { %s904_s4 = scalar_lea.vmem %s28_s24, 1024  ;;  %p909_p12 = scmp.lt.s32.totalorder %s28_s24, %s28_s24 }
  0x1b   :  { %p905_p11 = scmp.ne.s32.totalorder %s28_s24, %s904_s4  ;;  %p910_p13 = scmp.lt.s32.totalorder %s904_s4, %s904_s4 }
  0x1d   :  { %p911_p0 = por %p910_p13, %p909_p12 }
  0x1f   :  { %p912_p1 = pnand %p911_p0, %p905_p11 }
  0x21   :  { %915 = shalt.err (!%p912_p1)
}
  0x22   :  { %33 = dma.hbm_to_vmem [thread:$0]  %s1010_s1, 1024, %s28_s24, [#allocation6], %s945_s19, %s945_s19, %s946_s20  }
  0x23   :  { %938 = dma.done.wait [#allocation3], 2048  }
  0x24   :  { %939 = vsyncadd [#allocation3], 4294965248 }
  0x25   :  { %940 = dma.done.wait [#allocation6], 1024  }
  0x26   :  { %941 = vsyncadd [#allocation6], 4294966272  ;;  %v848_v0 = vld [vmem:[#allocation5] sm:$0xff]   ;;  %v849_v1 = vld [vmem:[#allocation5 + $0x8] sm:$0xff]   ;;  %s948_s1 = smov [#allocation7]  }
  0x27   :  { %779 = vmatprep.subr.bf16.mxu0 %v848_v0  ;;  %827 = vmatprep.subr.bf16.mxu1 %v848_v0  ;;  %v850_v2 = vld [vmem:[#allocation5 + $0x10] sm:$0xff]   ;;  %v851_v3 = vld [vmem:[#allocation5 + $0x18] sm:$0xff]   ;;  %v856_v4 = vld [vmem:[#allocation2] sm:$0xff]   ;;  %s559_s6 = sshll.u32 %s948_s1, 4  ;;  %s560_s6 = int_to_ptr.vmem [resolvable:$true] %s559_s6 }
  0x28   :  { %780 = vmatpush3.bf16.msra.mxu0 %v848_v0  ;;  %835 = vmatpush3.bf16.msra.mxu1 %v848_v0  ;;  %v857_v5 = vld [vmem:[#allocation2 + $0x40] sm:$0xff]   ;;  %v853_v7 = vld [vmem:[#allocation5 + $0x28] sm:$0xff]   ;;  %v854_v8 = vld [vmem:[#allocation5 + $0x30] sm:$0xff]   ;;  %s916_s7 = scalar_lea.vmem %s560_s6, 2048  ;;  %p921_p3 = scmp.lt.s32.totalorder %s560_s6, %s560_s6 }
  0x29   :  { %781 = vmatprep.subr.bf16.mxu0 %v849_v1  ;;  %828 = vmatprep.subr.bf16.mxu1 %v849_v1  ;;  %v852_v6 = vld [vmem:[#allocation5 + $0x20] sm:$0xff]   ;;  %v855_v9 = vld [vmem:[#allocation5 + $0x38] sm:$0xff]   ;;  %v858_v10 = vld [vmem:[#allocation2 + $0x8] sm:$0xff]   ;;  %p917_p2 = scmp.ne.s32.totalorder %s560_s6, %s916_s7  ;;  %p922_p4 = scmp.lt.s32.totalorder %s916_s7, %s916_s7 }
  0x2a   :  { %795 = vmatprep.mubr.bf16.mxu0 %v856_v4  ;;  %811 = vmatprep.mubr.bf16.mxu1 %v857_v5  ;;  %v859_v11 = vld [vmem:[#allocation2 + $0x48] sm:$0xff]   ;;  %v860_v12 = vld [vmem:[#allocation2 + $0x10] sm:$0xff]   ;;  %v862_v14 = vld [vmem:[#allocation2 + $0x18] sm:$0xff]  }
  0x2b   :  { %v861_v13 = vld [vmem:[#allocation2 + $0x50] sm:$0xff]   ;;  %v863_v15 = vld [vmem:[#allocation2 + $0x58] sm:$0xff]   ;;  %v864_v16 = vld [vmem:[#allocation2 + $0x20] sm:$0xff]   ;;  %p923_p5 = por %p922_p4, %p921_p3 }
  0x2c   :  { %782 = vmatpush3.bf16.msra.mxu0 %v849_v1  ;;  %836 = vmatpush3.bf16.msra.mxu1 %v849_v1  ;;  %v865_v17 = vld [vmem:[#allocation2 + $0x60] sm:$0xff]   ;;  %v866_v18 = vld [vmem:[#allocation2 + $0x28] sm:$0xff]   ;;  %v868_v20 = vld [vmem:[#allocation2 + $0x30] sm:$0xff]  }
  0x2d   :  { %783 = vmatprep.subr.bf16.mxu0 %v850_v2  ;;  %829 = vmatprep.subr.bf16.mxu1 %v850_v2  ;;  %v867_v19 = vld [vmem:[#allocation2 + $0x68] sm:$0xff]   ;;  %v869_v21 = vld [vmem:[#allocation2 + $0x70] sm:$0xff]   ;;  %v870_v22 = vld [vmem:[#allocation2 + $0x38] sm:$0xff]   ;;  %p924_p6 = pnand %p923_p5, %p917_p2 }
  0x2e   :  { %v871_v23 = vld [vmem:[#allocation2 + $0x78] sm:$0xff]  }
  0x30   :  { %784 = vmatpush3.bf16.msra.mxu0 %v850_v2  ;;  %837 = vmatpush3.bf16.msra.mxu1 %v850_v2 }
  0x31   :  { %785 = vmatprep.subr.bf16.mxu0 %v851_v3  ;;  %830 = vmatprep.subr.bf16.mxu1 %v851_v3 }
  0x34   :  { %786 = vmatpush3.bf16.msra.mxu0 %v851_v3  ;;  %838 = vmatpush3.bf16.msra.mxu1 %v851_v3 }
  0x35   :  { %787 = vmatprep.subr.bf16.mxu0 %v852_v6  ;;  %831 = vmatprep.subr.bf16.mxu1 %v852_v6 }
  0x38   :  { %788 = vmatpush3.bf16.msra.mxu0 %v852_v6  ;;  %839 = vmatpush3.bf16.msra.mxu1 %v852_v6 }
  0x39   :  { %789 = vmatprep.subr.bf16.mxu0 %v853_v7  ;;  %832 = vmatprep.subr.bf16.mxu1 %v853_v7 }
  0x3c   :  { %790 = vmatpush3.bf16.msra.mxu0 %v853_v7  ;;  %840 = vmatpush3.bf16.msra.mxu1 %v853_v7 }
  0x3d   :  { %791 = vmatprep.subr.bf16.mxu0 %v854_v8  ;;  %833 = vmatprep.subr.bf16.mxu1 %v854_v8 }
  0x40   :  { %792 = vmatpush3.bf16.msra.mxu0 %v854_v8  ;;  %841 = vmatpush3.bf16.msra.mxu1 %v854_v8 }
  0x41   :  { %793 = vmatprep.subr.bf16.mxu0 %v855_v9  ;;  %834 = vmatprep.subr.bf16.mxu1 %v855_v9 }
  0x44   :  { %794 = vmatpush3.bf16.msra.mxu0 %v855_v9  ;;  %842 = vmatpush3.bf16.msra.mxu1 %v855_v9 }
  0x47   :  { %796 = vmatmul.mubr.bf16.vlgmr.msra.gmra.mrb[0].mxu0 %v858_v10  ;;  %812 = vmatmul.mubr.bf16.vlgmr.msra.gmra.mrb[0].mxu1 %v859_v11 }
  0x48   :  { %799 = vmatprep.mubr.bf16.mxu0 %v860_v12  ;;  %815 = vmatprep.mubr.bf16.mxu1 %v861_v13 }
  0x4f   :  { %800 = vmatmul.mubr.bf16.gmra.mrb[4].mxu0 %v862_v14  ;;  %816 = vmatmul.mubr.bf16.gmra.mrb[4].mxu1 %v863_v15 }
  0x50   :  { %803 = vmatprep.mubr.bf16.mxu0 %v864_v16  ;;  %819 = vmatprep.mubr.bf16.mxu1 %v865_v17 }
  0x57   :  { %804 = vmatmul.mubr.bf16.gmra.mrb[8].mxu0 %v866_v18  ;;  %820 = vmatmul.mubr.bf16.gmra.mrb[8].mxu1 %v867_v19 }
  0x58   :  { %807 = vmatprep.mubr.bf16.mxu0 %v868_v20  ;;  %823 = vmatprep.mubr.bf16.mxu1 %v869_v21 }
  0x5f   :  { %808 = vmatmul.mubr.bf16.gmra.mrb[12].mxu0 %v870_v22  ;;  %824 = vmatmul.mubr.bf16.gmra.mrb[12].mxu1 %v871_v23 }
 0x11a   :  { %v797_v24 = vpop.f32.mrb[0].mxu0  ;;  %v813_v25 = vpop.f32.mrb[0].mxu1 }
 0x11b   :  { %v267_v26 = vpop.f32.mrb[1].mxu0  ;;  %v331_v27 = vpop.f32.mrb[1].mxu1 }
 0x11c   :  { %v798_v28 = vpop.f32.mrb[2].mxu0  ;;  %v814_v29 = vpop.f32.mrb[2].mxu1 }
 0x11d   :  { %v668_v30 = vpack.c.bf16 %v798_v28, %v797_v24  ;;  %v708_v31 = vpack.c.bf16 %v814_v29, %v813_v25  ;;  %v270_v32 = vpop.f32.mrb[3].mxu0  ;;  %v334_v33 = vpop.f32.mrb[3].mxu1 }
 0x11e   :  { %v663_v34 = vpack.c.bf16 %v270_v32, %v267_v26  ;;  %v703_v35 = vpack.c.bf16 %v334_v33, %v331_v27 }
 0x11f   :  { %740 = vst [vmem:[#allocation7 + $0x8] sm:$0xff] %v668_v30   ;;  %748 = vst [vmem:[#allocation7 + $0x48] sm:$0xff] %v708_v31  }
 0x120   :  { %664 = vst [vmem:[#allocation7] sm:$0xff] %v663_v34   ;;  %747 = vst [vmem:[#allocation7 + $0x40] sm:$0xff] %v703_v35  }
 0x122   :  { %v801_v36 = vpop.f32.mrb[4].mxu0  ;;  %v817_v37 = vpop.f32.mrb[4].mxu1 }
 0x123   :  { %v283_v38 = vpop.f32.mrb[5].mxu0  ;;  %v347_v39 = vpop.f32.mrb[5].mxu1 }
 0x124   :  { %v802_v40 = vpop.f32.mrb[6].mxu0  ;;  %v818_v41 = vpop.f32.mrb[6].mxu1 }
 0x125   :  { %v678_v42 = vpack.c.bf16 %v802_v40, %v801_v36  ;;  %v718_v43 = vpack.c.bf16 %v818_v41, %v817_v37  ;;  %v286_v44 = vpop.f32.mrb[7].mxu0  ;;  %v350_v45 = vpop.f32.mrb[7].mxu1 }
 0x126   :  { %v673_v46 = vpack.c.bf16 %v286_v44, %v283_v38  ;;  %v713_v47 = vpack.c.bf16 %v350_v45, %v347_v39 }
 0x127   :  { %742 = vst [vmem:[#allocation7 + $0x18] sm:$0xff] %v678_v42   ;;  %750 = vst [vmem:[#allocation7 + $0x58] sm:$0xff] %v718_v43  }
 0x128   :  { %741 = vst [vmem:[#allocation7 + $0x10] sm:$0xff] %v673_v46   ;;  %749 = vst [vmem:[#allocation7 + $0x50] sm:$0xff] %v713_v47  }
 0x12a   :  { %v805_v48 = vpop.f32.mrb[8].mxu0  ;;  %v821_v49 = vpop.f32.mrb[8].mxu1 }
 0x12b   :  { %v299_v50 = vpop.f32.mrb[9].mxu0  ;;  %v363_v51 = vpop.f32.mrb[9].mxu1 }
 0x12c   :  { %v806_v52 = vpop.f32.mrb[10].mxu0  ;;  %v822_v53 = vpop.f32.mrb[10].mxu1 }
 0x12d   :  { %v688_v54 = vpack.c.bf16 %v806_v52, %v805_v48  ;;  %v728_v55 = vpack.c.bf16 %v822_v53, %v821_v49  ;;  %v302_v56 = vpop.f32.mrb[11].mxu0  ;;  %v366_v57 = vpop.f32.mrb[11].mxu1 }
 0x12e   :  { %v683_v58 = vpack.c.bf16 %v302_v56, %v299_v50  ;;  %v723_v59 = vpack.c.bf16 %v366_v57, %v363_v51 }
 0x12f   :  { %744 = vst [vmem:[#allocation7 + $0x28] sm:$0xff] %v688_v54   ;;  %752 = vst [vmem:[#allocation7 + $0x68] sm:$0xff] %v728_v55  }
 0x130   :  { %743 = vst [vmem:[#allocation7 + $0x20] sm:$0xff] %v683_v58   ;;  %751 = vst [vmem:[#allocation7 + $0x60] sm:$0xff] %v723_v59  }
 0x132   :  { %v809_v60 = vpop.f32.mrb[12].mxu0  ;;  %v825_v61 = vpop.f32.mrb[12].mxu1 }
 0x133   :  { %v315_v62 = vpop.f32.mrb[13].mxu0  ;;  %v379_v63 = vpop.f32.mrb[13].mxu1 }
 0x134   :  { %v810_v0 = vpop.f32.mrb[14].mxu0  ;;  %v826_v1 = vpop.f32.mrb[14].mxu1 }
 0x135   :  { %v698_v2 = vpack.c.bf16 %v810_v0, %v809_v60  ;;  %v738_v3 = vpack.c.bf16 %v826_v1, %v825_v61  ;;  %v318_v4 = vpop.f32.mrb[15].mxu0  ;;  %v382_v5 = vpop.f32.mrb[15].mxu1 }
 0x136   :  { %v693_v6 = vpack.c.bf16 %v318_v4, %v315_v62  ;;  %v733_v7 = vpack.c.bf16 %v382_v5, %v379_v63 }
 0x137   :  { %746 = vst [vmem:[#allocation7 + $0x38] sm:$0xff] %v698_v2   ;;  %754 = vst [vmem:[#allocation7 + $0x78] sm:$0xff] %v738_v3  }
 0x138   :  { %745 = vst [vmem:[#allocation7 + $0x30] sm:$0xff] %v693_v6   ;;  %753 = vst [vmem:[#allocation7 + $0x70] sm:$0xff] %v733_v7  }
 0x139   :  { %927 = shalt.err (!%p924_p6)
}
 0x13a   :  { %s928_s10 = scalar_lea.hbm %s1011_s2, 2048 }
 0x13b   :  { %p929_p7 = scmp.ne.s32.totalorder %s1011_s2, %s928_s10  ;;  %p932_p8 = scmp.lt.u32.totalorder %s928_s10, %s1011_s2 }
 0x13d   :  { %p934_p9 = pnand %p932_p8, %p929_p7 }
 0x13f   :  { %937 = shalt.err (!%p934_p9)
}
 0x140   :  { %565 = dma.vmem_to_hbm [thread:$0]  %s560_s6, 2048, %s1011_s2, [#allocation4], %s945_s19, %s945_s19, %s946_s20  }
 0x141   :  { %942 = dma.done.wait [#allocation4], 2048  }
 0x142   :  { %943 = vsyncadd [#allocation4], 4294965248 }
 0x143   :  { %569 = vsyncpa [#allocation3], 1 }
 0x144   :  { %570 = vsyncpa [#allocation6], 1 }
 0x145   :  { %571 = vsyncpa [#allocation4], 1 }

</bundles_post_ra>
